<compile_context>
chip_gen: v7x
topology: tpu7x:2x2x1
jax: 0.10.0
libtpu: 0.0.40
codegen_flags: <defaults>
</compile_context>

<pallas_src>
import functools

import numpy as np

import jax
import jax.numpy as jnp
from jax import lax
from jax.experimental import pallas as pl
from jax.experimental.pallas import tpu as pltpu


def _upconv_kernel(x_ref, m_ref, rh_ref, bias_ref, o_ref, b2_ref, *,
                   cin, kh_sz, h, w, th, cw):
    """One grid step = one image x one tile of output rows.

    x_ref   : (1, Cin*H, W)        original (pre-upsample) image, VMEM
    m_ref   : (Cin*KH*W, Cout*Wo)  conv weights folded with the W-direction gather, VMEM
    rh_ref  : (KH*th, H)           one-hot row gather (upsample+reflect+stride+tap), VMEM
    bias_ref: (1, Cout*Wo)         bias replicated over Wo lanes, VMEM
    o_ref   : (1, th, Cout*Wo)     output tile, channels-in-lanes, VMEM
    b2_ref  : (KH*H, Cout*Wo)      per-image scratch: weight+column-gather contracted input
    """
    # --- once per image: contract x over (ci, ww, kw) with the folded weight table ----
    @pl.when(pl.program_id(1) == 0)
    def _():
        x2 = x_ref[0].astype(jnp.float32)                               # (Cin*H, W)
        for kh in range(kh_sz):
            acc = jnp.zeros((h, cw), jnp.float32)
            for ci in range(cin):
                row0 = (ci * kh_sz + kh) * w
                acc = acc + jnp.dot(x2[ci * h:(ci + 1) * h, :],
                                    m_ref[row0:row0 + w, :],
                                    preferred_element_type=jnp.float32)  # (H, Cout*Wo)
            b2_ref[kh * h:(kh + 1) * h, :] = acc

    # --- per row tile: H-direction gather rides a matmul; sum over kh taps ------------
    acc = jnp.zeros((th, cw), jnp.float32)
    for kh in range(kh_sz):
        acc = acc + jnp.dot(rh_ref[kh * th:(kh + 1) * th, :],
                            b2_ref[kh * h:(kh + 1) * h, :],
                            preferred_element_type=jnp.float32)          # (th, Cout*Wo)

    o_ref[0] = (acc + bias_ref[...]).astype(o_ref.dtype)                 # lane-dense store


def _pick_row_tile(Ho, H, W, Cin, Cout, KH, Wo, itemsize, budget_bytes):
    """Largest row tile whose resident blocks fit the VMEM budget."""
    cw = Cout * Wo

    def need(th):
        x_blk = Cin * H * W * itemsize
        m_tbl = Cin * KH * W * cw * 4
        rh_blk = KH * th * H * 4
        out_blk = th * cw * itemsize
        b2 = KH * H * cw * 4
        bias = cw * 4
        # BlockSpec inputs/outputs are double-buffered by default.
        return 2 * (x_blk + m_tbl + rh_blk + out_blk) + b2 + bias

    cands = [Ho] + [d for d in range((Ho // 8) * 8, 0, -8) if Ho % d == 0]
    for th in cands:
        if need(th) <= budget_bytes:
            return th, need(th)
    th = cands[-1]
    return th, need(th)


def upsample_conv_layer(x_nchw, weight_oihw, bias, *, stride=1, upsample=None,
                        vmem_budget_bytes=40 * 1024 * 1024):
    """Forward pass identical to the PyTorch UpsampleConvLayer.

    x_nchw:      (N, Cin, H, W)
    weight_oihw: (Cout, Cin, KH, KW)   (torch Conv2d layout)
    bias:        (Cout,)
    returns:     (N, Cout, Ho, Wo)
    """
    N, Cin, H, W = x_nchw.shape
    Cout, Cin_w, KH, KW = weight_oihw.shape
    assert Cin_w == Cin
    assert KH == KW, "UpsampleConvLayer uses a scalar kernel_size (square kernel)"
    up = int(upsample) if upsample else 1
    pad = KH // 2
    Hu, Wu = H * up, W * up
    assert pad < Hu and pad < Wu, "reflection pad must be smaller than the upsampled size"
    Ho = (Hu + 2 * pad - KH) // stride + 1
    Wo = (Wu + 2 * pad - KW) // stride + 1
    CW = Cout * Wo

    # --- row tiling: largest tile that fits the (generation-safe) VMEM budget ---------
    th, vmem_need = _pick_row_tile(Ho, H, W, Cin, Cout, KH, Wo,
                                   jnp.dtype(x_nchw.dtype).itemsize, vmem_budget_bytes)
    T = Ho // th
    # Derived limit, capped so it is safe on v7x (64 MiB physical VMEM) too.
    vmem_limit = int(min(max(vmem_need + (8 << 20), 32 << 20), 48 << 20))

    # --- static index helpers: nearest-upsample + reflection-pad + stride -------------
    def src(i, size_up):
        t = i - pad
        if t < 0:
            t = -t                                   # ReflectionPad2d semantics
        if t >= size_up:
            t = 2 * (size_up - 1) - t
        return t // up                               # nearest-neighbor upsample

    # Row gather: one-hot, per row tile / tap.  rh[(t*KH + kh)*th + r, hh]
    rsel = np.array([src((t * th + r) * stride + kh, Hu)
                     for t in range(T) for kh in range(KH) for r in range(th)], np.int32)
    rh = jax.nn.one_hot(jnp.asarray(rsel), H, dtype=jnp.float32)          # (T*KH*th, H)

    # Column gather folded with the conv weights (wrapper-side, weight-sized work only):
    #   M[(ci*KH + kh)*W + ww, co*Wo + c] = sum_kw Wt[co,ci,kh,kw] * [ww == wsrc(c*stride + kw)]
    wsel = np.array([[src(c * stride + kw, Wu) for c in range(Wo)] for kw in range(KW)],
                    np.int32)                                             # (KW, Wo)
    col_onehot = jax.nn.one_hot(jnp.asarray(wsel), W, dtype=jnp.float32)  # (KW, Wo, W)
    m_tab = jnp.einsum('oikj,jcw->ikwoc', weight_oihw.astype(jnp.float32), col_onehot)
    m_tab = m_tab.reshape(Cin * KH * W, CW)                               # (Cin*KH*W, Cout*Wo)

    bias_row = jnp.repeat(bias.astype(jnp.float32), Wo).reshape(1, CW)    # (1, Cout*Wo)

    # Free metadata reshape; the kernel upcasts in-VMEM (no extra HBM pass for bf16 inputs).
    x2 = x_nchw.reshape(N, Cin * H, W)

    kernel = functools.partial(_upconv_kernel, cin=Cin, kh_sz=KH, h=H, w=W, th=th, cw=CW)

    out3 = pl.pallas_call(
        kernel,
        out_shape=jax.ShapeDtypeStruct((N, Ho, CW), x_nchw.dtype),
        grid=(N, T),
        in_specs=[
            pl.BlockSpec((1, Cin * H, W), lambda n, t: (n, 0, 0)),
            pl.BlockSpec((Cin * KH * W, CW), lambda n, t: (0, 0)),
            pl.BlockSpec((KH * th, H), lambda n, t: (t, 0)),
            pl.BlockSpec((1, CW), lambda n, t: (0, 0)),
        ],
        out_specs=pl.BlockSpec((1, th, CW), lambda n, t: (n, t, 0)),
        scratch_shapes=[pltpu.VMEM((KH * H, CW), jnp.float32)],
        compiler_params=pltpu.CompilerParams(
            # t axis must be "arbitrary": the per-image B2 scratch is carried across it.
            dimension_semantics=("parallel", "arbitrary"),
            vmem_limit_bytes=vmem_limit,
        ),
    )(x2, m_tab, rh, bias_row)

    # Channels-in-lanes -> NCHW: one cheap wrapper-side transpose over the output.
    out = out3.reshape(N, Ho, Cout, Wo).transpose(0, 2, 1, 3)
    return out


def _reference(x_nchw, weight_oihw, bias, *, stride=1, upsample=None):
    """Pure-JAX reference (mirrors torch semantics) for a correctness check."""
    x = x_nchw
    if upsample:
        up = int(upsample)
        x = jnp.repeat(jnp.repeat(x, up, axis=2), up, axis=3)
    pad = weight_oihw.shape[2] // 2
    x = jnp.pad(x, ((0, 0), (0, 0), (pad, pad), (pad, pad)), mode="reflect")
    out = lax.conv_general_dilated(
        x, weight_oihw, window_strides=(stride, stride), padding="VALID",
        dimension_numbers=("NCHW", "OIHW", "NCHW"),
    )
    return out + bias.reshape(1, -1, 1, 1)


if __name__ == "__main__":
    # Module config (matches UpsampleConvLayer.__init__ shapes):
    in_channels, out_channels = 4, 8
    kernel_size, stride, upsample = 3, 1, 2
    N, H, W = 2, 16, 16

    key = jax.random.PRNGKey(0)
    kx, kw_, kb = jax.random.split(key, 3)
    x = jax.random.normal(kx, (N, in_channels, H, W), dtype=jnp.float32)
    weight = jax.random.normal(
        kw_, (out_channels, in_channels, kernel_size, kernel_size), dtype=jnp.float32
    ) * 0.1
    bias = jax.random.normal(kb, (out_channels,), dtype=jnp.float32) * 0.1

    out = upsample_conv_layer(x, weight, bias, stride=stride, upsample=upsample)
    out = jax.block_until_ready(out)

    ref = _reference(x, weight, bias, stride=stride, upsample=upsample)
    assert out.shape == ref.shape == (N, out_channels, H * upsample, W * upsample)
    assert jnp.allclose(out, ref, atol=1e-4, rtol=1e-4), "mismatch vs reference"

    print("KERNEL_OK")
</pallas_src>

<mosaic_0001>
module attributes {stable_mosaic.version = 11 : i64} {
  func.func @_upconv_kernel(%arg0: i32, %arg1: i32, %arg2: memref<1x64x16xf32, #tpu.memory_space<vmem>>, %arg3: memref<192x256xf32, #tpu.memory_space<vmem>>, %arg4: memref<96x16xf32, #tpu.memory_space<vmem>>, %arg5: memref<1x256xf32, #tpu.memory_space<vmem>>, %arg6: memref<1x32x256xf32, #tpu.memory_space<vmem>>, %arg7: memref<48x256xf32, #tpu.memory_space<vmem>>) attributes {dimension_semantics = [#tpu.dimension_semantics<parallel>, #tpu.dimension_semantics<arbitrary>], iteration_bounds = array<i64: 2, 1>, scalar_prefetch = 0 : i64, scratch_operands = 1 : i64, tpu.core_type = #tpu.core_type<tc>, window_params = [{transform_indices = @transform_0, window_bounds = array<i64: 1, 64, 16>}, {pipeline_mode = #tpu.pipeline_mode<synchronous>, transform_indices = @transform_1, window_bounds = array<i64: 192, 256>}, {transform_indices = @transform_2, window_bounds = array<i64: 96, 16>}, {pipeline_mode = #tpu.pipeline_mode<synchronous>, transform_indices = @transform_3, window_bounds = array<i64: 1, 256>}, {transform_indices = @transform_4, window_bounds = array<i64: 1, 32, 256>}]} {
    %c0_i32 = arith.constant 0 : i32
    %0 = arith.cmpi eq, %arg1, %c0_i32 : i32
    %1 = arith.extui %0 : i1 to i32
    %c0_i32_0 = arith.constant 0 : i32
    %2 = arith.cmpi ne, %1, %c0_i32_0 : i32
    scf.if %2 {
      %c0_17 = arith.constant 0 : index
      %c0_18 = arith.constant 0 : index
      %c0_19 = arith.constant 0 : index
      %22 = vector.load %arg2[%c0_17, %c0_18, %c0_19] : memref<1x64x16xf32, #tpu.memory_space<vmem>>, vector<1x64x16xf32>
      %23 = vector.shape_cast %22 : vector<1x64x16xf32> to vector<64x16xf32>
      %cst_20 = arith.constant 0.000000e+00 : f32
      %24 = vector.broadcast %cst_20 : f32 to vector<16x256xf32>
      %25 = vector.extract_strided_slice %23 {offsets = [0, 0], sizes = [16, 16], strides = [1, 1]} : vector<64x16xf32> to vector<16x16xf32>
      %c0_21 = arith.constant 0 : index
      %c0_22 = arith.constant 0 : index
      %26 = vector.load %arg3[%c0_21, %c0_22] : memref<192x256xf32, #tpu.memory_space<vmem>>, vector<16x256xf32>
      %cst_23 = arith.constant dense<0.000000e+00> : vector<16x256xf32>
      %27 = tpu.matmul %25, %26, %cst_23 {dimension_numbers = #tpu.dot_dimension_numbers<[1], [0], [0], [1], [0, 0, 1, 1], [], []>} : vector<16x16xf32>, vector<16x256xf32>, vector<16x256xf32> -> vector<16x256xf32>
      %28 = arith.addf %24, %27 : vector<16x256xf32>
      %29 = vector.extract_strided_slice %23 {offsets = [16, 0], sizes = [16, 16], strides = [1, 1]} : vector<64x16xf32> to vector<16x16xf32>
      %c48 = arith.constant 48 : index
      %c0_24 = arith.constant 0 : index
      %30 = vector.load %arg3[%c48, %c0_24] : memref<192x256xf32, #tpu.memory_space<vmem>>, vector<16x256xf32>
      %cst_25 = arith.constant dense<0.000000e+00> : vector<16x256xf32>
      %31 = tpu.matmul %29, %30, %cst_25 {dimension_numbers = #tpu.dot_dimension_numbers<[1], [0], [0], [1], [0, 0, 1, 1], [], []>} : vector<16x16xf32>, vector<16x256xf32>, vector<16x256xf32> -> vector<16x256xf32>
      %32 = arith.addf %28, %31 : vector<16x256xf32>
      %33 = vector.extract_strided_slice %23 {offsets = [32, 0], sizes = [16, 16], strides = [1, 1]} : vector<64x16xf32> to vector<16x16xf32>
      %c96 = arith.constant 96 : index
      %c0_26 = arith.constant 0 : index
      %34 = vector.load %arg3[%c96, %c0_26] : memref<192x256xf32, #tpu.memory_space<vmem>>, vector<16x256xf32>
      %cst_27 = arith.constant dense<0.000000e+00> : vector<16x256xf32>
      %35 = tpu.matmul %33, %34, %cst_27 {dimension_numbers = #tpu.dot_dimension_numbers<[1], [0], [0], [1], [0, 0, 1, 1], [], []>} : vector<16x16xf32>, vector<16x256xf32>, vector<16x256xf32> -> vector<16x256xf32>
      %36 = arith.addf %32, %35 : vector<16x256xf32>
      %37 = vector.extract_strided_slice %23 {offsets = [48, 0], sizes = [16, 16], strides = [1, 1]} : vector<64x16xf32> to vector<16x16xf32>
      %c144 = arith.constant 144 : index
      %c0_28 = arith.constant 0 : index
      %38 = vector.load %arg3[%c144, %c0_28] : memref<192x256xf32, #tpu.memory_space<vmem>>, vector<16x256xf32>
      %cst_29 = arith.constant dense<0.000000e+00> : vector<16x256xf32>
      %39 = tpu.matmul %37, %38, %cst_29 {dimension_numbers = #tpu.dot_dimension_numbers<[1], [0], [0], [1], [0, 0, 1, 1], [], []>} : vector<16x16xf32>, vector<16x256xf32>, vector<16x256xf32> -> vector<16x256xf32>
      %40 = arith.addf %36, %39 : vector<16x256xf32>
      %c0_30 = arith.constant 0 : index
      %c0_31 = arith.constant 0 : index
      %41 = vector.load %arg7[%c0_30, %c0_31] : memref<48x256xf32, #tpu.memory_space<vmem>>, vector<16x256xf32>
      tpu.vector_store %arg7[%c0_30, %c0_31], %40 {strides = array<i32>} : memref<48x256xf32, #tpu.memory_space<vmem>>, vector<16x256xf32>,
      %cst_32 = arith.constant 0.000000e+00 : f32
      %42 = vector.broadcast %cst_32 : f32 to vector<16x256xf32>
      %43 = vector.extract_strided_slice %23 {offsets = [0, 0], sizes = [16, 16], strides = [1, 1]} : vector<64x16xf32> to vector<16x16xf32>
      %c16_33 = arith.constant 16 : index
      %c0_34 = arith.constant 0 : index
      %44 = vector.load %arg3[%c16_33, %c0_34] : memref<192x256xf32, #tpu.memory_space<vmem>>, vector<16x256xf32>
      %cst_35 = arith.constant dense<0.000000e+00> : vector<16x256xf32>
      %45 = tpu.matmul %43, %44, %cst_35 {dimension_numbers = #tpu.dot_dimension_numbers<[1], [0], [0], [1], [0, 0, 1, 1], [], []>} : vector<16x16xf32>, vector<16x256xf32>, vector<16x256xf32> -> vector<16x256xf32>
      %46 = arith.addf %42, %45 : vector<16x256xf32>
      %47 = vector.extract_strided_slice %23 {offsets = [16, 0], sizes = [16, 16], strides = [1, 1]} : vector<64x16xf32> to vector<16x16xf32>
      %c64_36 = arith.constant 64 : index
      %c0_37 = arith.constant 0 : index
      %48 = vector.load %arg3[%c64_36, %c0_37] : memref<192x256xf32, #tpu.memory_space<vmem>>, vector<16x256xf32>
      %cst_38 = arith.constant dense<0.000000e+00> : vector<16x256xf32>
      %49 = tpu.matmul %47, %48, %cst_38 {dimension_numbers = #tpu.dot_dimension_numbers<[1], [0], [0], [1], [0, 0, 1, 1], [], []>} : vector<16x16xf32>, vector<16x256xf32>, vector<16x256xf32> -> vector<16x256xf32>
      %50 = arith.addf %46, %49 : vector<16x256xf32>
      %51 = vector.extract_strided_slice %23 {offsets = [32, 0], sizes = [16, 16], strides = [1, 1]} : vector<64x16xf32> to vector<16x16xf32>
      %c112 = arith.constant 112 : index
      %c0_39 = arith.constant 0 : index
      %52 = vector.load %arg3[%c112, %c0_39] : memref<192x256xf32, #tpu.memory_space<vmem>>, vector<16x256xf32>
      %cst_40 = arith.constant dense<0.000000e+00> : vector<16x256xf32>
      %53 = tpu.matmul %51, %52, %cst_40 {dimension_numbers = #tpu.dot_dimension_numbers<[1], [0], [0], [1], [0, 0, 1, 1], [], []>} : vector<16x16xf32>, vector<16x256xf32>, vector<16x256xf32> -> vector<16x256xf32>
      %54 = arith.addf %50, %53 : vector<16x256xf32>
      %55 = vector.extract_strided_slice %23 {offsets = [48, 0], sizes = [16, 16], strides = [1, 1]} : vector<64x16xf32> to vector<16x16xf32>
      %c160 = arith.constant 160 : index
      %c0_41 = arith.constant 0 : index
      %56 = vector.load %arg3[%c160, %c0_41] : memref<192x256xf32, #tpu.memory_space<vmem>>, vector<16x256xf32>
      %cst_42 = arith.constant dense<0.000000e+00> : vector<16x256xf32>
      %57 = tpu.matmul %55, %56, %cst_42 {dimension_numbers = #tpu.dot_dimension_numbers<[1], [0], [0], [1], [0, 0, 1, 1], [], []>} : vector<16x16xf32>, vector<16x256xf32>, vector<16x256xf32> -> vector<16x256xf32>
      %58 = arith.addf %54, %57 : vector<16x256xf32>
      %c16_43 = arith.constant 16 : index
      %c0_44 = arith.constant 0 : index
      %59 = vector.load %arg7[%c16_43, %c0_44] : memref<48x256xf32, #tpu.memory_space<vmem>>, vector<16x256xf32>
      tpu.vector_store %arg7[%c16_43, %c0_44], %58 {strides = array<i32>} : memref<48x256xf32, #tpu.memory_space<vmem>>, vector<16x256xf32>,
      %cst_45 = arith.constant 0.000000e+00 : f32
      %60 = vector.broadcast %cst_45 : f32 to vector<16x256xf32>
      %61 = vector.extract_strided_slice %23 {offsets = [0, 0], sizes = [16, 16], strides = [1, 1]} : vector<64x16xf32> to vector<16x16xf32>
      %c32_46 = arith.constant 32 : index
      %c0_47 = arith.constant 0 : index
      %62 = vector.load %arg3[%c32_46, %c0_47] : memref<192x256xf32, #tpu.memory_space<vmem>>, vector<16x256xf32>
      %cst_48 = arith.constant dense<0.000000e+00> : vector<16x256xf32>
      %63 = tpu.matmul %61, %62, %cst_48 {dimension_numbers = #tpu.dot_dimension_numbers<[1], [0], [0], [1], [0, 0, 1, 1], [], []>} : vector<16x16xf32>, vector<16x256xf32>, vector<16x256xf32> -> vector<16x256xf32>
      %64 = arith.addf %60, %63 : vector<16x256xf32>
      %65 = vector.extract_strided_slice %23 {offsets = [16, 0], sizes = [16, 16], strides = [1, 1]} : vector<64x16xf32> to vector<16x16xf32>
      %c80 = arith.constant 80 : index
      %c0_49 = arith.constant 0 : index
      %66 = vector.load %arg3[%c80, %c0_49] : memref<192x256xf32, #tpu.memory_space<vmem>>, vector<16x256xf32>
      %cst_50 = arith.constant dense<0.000000e+00> : vector<16x256xf32>
      %67 = tpu.matmul %65, %66, %cst_50 {dimension_numbers = #tpu.dot_dimension_numbers<[1], [0], [0], [1], [0, 0, 1, 1], [], []>} : vector<16x16xf32>, vector<16x256xf32>, vector<16x256xf32> -> vector<16x256xf32>
      %68 = arith.addf %64, %67 : vector<16x256xf32>
      %69 = vector.extract_strided_slice %23 {offsets = [32, 0], sizes = [16, 16], strides = [1, 1]} : vector<64x16xf32> to vector<16x16xf32>
      %c128 = arith.constant 128 : index
      %c0_51 = arith.constant 0 : index
      %70 = vector.load %arg3[%c128, %c0_51] : memref<192x256xf32, #tpu.memory_space<vmem>>, vector<16x256xf32>
      %cst_52 = arith.constant dense<0.000000e+00> : vector<16x256xf32>
      %71 = tpu.matmul %69, %70, %cst_52 {dimension_numbers = #tpu.dot_dimension_numbers<[1], [0], [0], [1], [0, 0, 1, 1], [], []>} : vector<16x16xf32>, vector<16x256xf32>, vector<16x256xf32> -> vector<16x256xf32>
      %72 = arith.addf %68, %71 : vector<16x256xf32>
      %73 = vector.extract_strided_slice %23 {offsets = [48, 0], sizes = [16, 16], strides = [1, 1]} : vector<64x16xf32> to vector<16x16xf32>
      %c176 = arith.constant 176 : index
      %c0_53 = arith.constant 0 : index
      %74 = vector.load %arg3[%c176, %c0_53] : memref<192x256xf32, #tpu.memory_space<vmem>>, vector<16x256xf32>
      %cst_54 = arith.constant dense<0.000000e+00> : vector<16x256xf32>
      %75 = tpu.matmul %73, %74, %cst_54 {dimension_numbers = #tpu.dot_dimension_numbers<[1], [0], [0], [1], [0, 0, 1, 1], [], []>} : vector<16x16xf32>, vector<16x256xf32>, vector<16x256xf32> -> vector<16x256xf32>
      %76 = arith.addf %72, %75 : vector<16x256xf32>
      %c32_55 = arith.constant 32 : index
      %c0_56 = arith.constant 0 : index
      %77 = vector.load %arg7[%c32_55, %c0_56] : memref<48x256xf32, #tpu.memory_space<vmem>>, vector<16x256xf32>
      tpu.vector_store %arg7[%c32_55, %c0_56], %76 {strides = array<i32>} : memref<48x256xf32, #tpu.memory_space<vmem>>, vector<16x256xf32>,
    } else {
    }
    %cst = arith.constant 0.000000e+00 : f32
    %3 = vector.broadcast %cst : f32 to vector<32x256xf32>
    %c0 = arith.constant 0 : index
    %c0_1 = arith.constant 0 : index
    %4 = vector.load %arg4[%c0, %c0_1] : memref<96x16xf32, #tpu.memory_space<vmem>>, vector<32x16xf32>
    %c0_2 = arith.constant 0 : index
    %c0_3 = arith.constant 0 : index
    %5 = vector.load %arg7[%c0_2, %c0_3] : memref<48x256xf32, #tpu.memory_space<vmem>>, vector<16x256xf32>
    %cst_4 = arith.constant dense<0.000000e+00> : vector<32x256xf32>
    %6 = tpu.matmul %4, %5, %cst_4 {dimension_numbers = #tpu.dot_dimension_numbers<[1], [0], [0], [1], [0, 0, 1, 1], [], []>} : vector<32x16xf32>, vector<16x256xf32>, vector<32x256xf32> -> vector<32x256xf32>
    %7 = arith.addf %3, %6 : vector<32x256xf32>
    %c32 = arith.constant 32 : index
    %c0_5 = arith.constant 0 : index
    %8 = vector.load %arg4[%c32, %c0_5] : memref<96x16xf32, #tpu.memory_space<vmem>>, vector<32x16xf32>
    %c16 = arith.constant 16 : index
    %c0_6 = arith.constant 0 : index
    %9 = vector.load %arg7[%c16, %c0_6] : memref<48x256xf32, #tpu.memory_space<vmem>>, vector<16x256xf32>
    %cst_7 = arith.constant dense<0.000000e+00> : vector<32x256xf32>
    %10 = tpu.matmul %8, %9, %cst_7 {dimension_numbers = #tpu.dot_dimension_numbers<[1], [0], [0], [1], [0, 0, 1, 1], [], []>} : vector<32x16xf32>, vector<16x256xf32>, vector<32x256xf32> -> vector<32x256xf32>
    %11 = arith.addf %7, %10 : vector<32x256xf32>
    %c64 = arith.constant 64 : index
    %c0_8 = arith.constant 0 : index
    %12 = vector.load %arg4[%c64, %c0_8] : memref<96x16xf32, #tpu.memory_space<vmem>>, vector<32x16xf32>
    %c32_9 = arith.constant 32 : index
    %c0_10 = arith.constant 0 : index
    %13 = vector.load %arg7[%c32_9, %c0_10] : memref<48x256xf32, #tpu.memory_space<vmem>>, vector<16x256xf32>
    %cst_11 = arith.constant dense<0.000000e+00> : vector<32x256xf32>
    %14 = tpu.matmul %12, %13, %cst_11 {dimension_numbers = #tpu.dot_dimension_numbers<[1], [0], [0], [1], [0, 0, 1, 1], [], []>} : vector<32x16xf32>, vector<16x256xf32>, vector<32x256xf32> -> vector<32x256xf32>
    %15 = arith.addf %11, %14 : vector<32x256xf32>
    %c0_12 = arith.constant 0 : index
    %c0_13 = arith.constant 0 : index
    %16 = vector.load %arg5[%c0_12, %c0_13] : memref<1x256xf32, #tpu.memory_space<vmem>>, vector<1x256xf32>
    %17 = vector.broadcast %16 : vector<1x256xf32> to vector<32x256xf32>
    %18 = arith.addf %15, %17 : vector<32x256xf32>
    %c0_14 = arith.constant 0 : index
    %c0_15 = arith.constant 0 : index
    %c0_16 = arith.constant 0 : index
    %19 = vector.load %arg6[%c0_14, %c0_15, %c0_16] : memref<1x32x256xf32, #tpu.memory_space<vmem>>, vector<1x32x256xf32>
    %20 = vector.shape_cast %19 : vector<1x32x256xf32> to vector<32x256xf32>
    %21 = vector.shape_cast %18 : vector<32x256xf32> to vector<1x32x256xf32>
    tpu.vector_store %arg6[%c0_14, %c0_15, %c0_16], %21 {strides = array<i32>} : memref<1x32x256xf32, #tpu.memory_space<vmem>>, vector<1x32x256xf32>,
    return
  }
  func.func @transform_0(%arg0: i32, %arg1: i32) -> (i32, i32, i32) {
    %c0_i32 = arith.constant 0 : i32
    %c0_i32_0 = arith.constant 0 : i32
    %c0_i32_1 = arith.constant 0 : i32
    return %arg0, %c0_i32, %c0_i32_0 : i32, i32, i32
  }
  func.func @transform_1(%arg0: i32, %arg1: i32) -> (i32, i32) {
    %c0_i32 = arith.constant 0 : i32
    %c0_i32_0 = arith.constant 0 : i32
    %c0_i32_1 = arith.constant 0 : i32
    return %c0_i32, %c0_i32_0 : i32, i32
  }
  func.func @transform_2(%arg0: i32, %arg1: i32) -> (i32, i32) {
    %c0_i32 = arith.constant 0 : i32
    %c0_i32_0 = arith.constant 0 : i32
    return %arg1, %c0_i32 : i32, i32
  }
  func.func @transform_3(%arg0: i32, %arg1: i32) -> (i32, i32) {
    %c0_i32 = arith.constant 0 : i32
    %c0_i32_0 = arith.constant 0 : i32
    %c0_i32_1 = arith.constant 0 : i32
    return %c0_i32, %c0_i32_0 : i32, i32
  }
  func.func @transform_4(%arg0: i32, %arg1: i32) -> (i32, i32, i32) {
    %c0_i32 = arith.constant 0 : i32
    %c0_i32_0 = arith.constant 0 : i32
    return %arg0, %arg1, %c0_i32 : i32, i32, i32
  }
}

</mosaic_0001>

<bundles_post_ra>
// kernel: tpu_custom_call.1
= control target key start
LH: loop header
LB: loop body
LE: loop exit
PB: predicated region body
PF: predicated region fallthrough
CT: control target
= control target key end

     0   :  { %9 = vsyncpa [#allocation4], 0  ;;  %s2468_s0 = inlined_call_operand.vmem [shape: f32[2,64,16], index: 0, kind: input, shape index: {}]   ;;  %s2469_s1 = inlined_call_operand.hbm [shape: f32[192,256], index: 1, kind: input, shape index: {}]   ;;  %s2470_s2 = inlined_call_operand.vmem [shape: f32[96,16], index: 2, kind: input, shape index: {}]   ;;  %s2471_s3 = inlined_call_operand.vmem [shape: f32[1,256], index: 3, kind: input, shape index: {}]   ;;  %s2472_s4 = inlined_call_operand.hbm [shape: f32[2,32,256], index: 4, kind: output, shape index: {}]  }
   0x1   :  { %10 = vsyncpa [#allocation5], 0 }
   0x2   :  { %12 = vsyncpa [#allocation5 + $0x1], 0  ;;  %s2155_s15 = smov 0   ;;  %s2157_s16 = smov 0  }
   0x3   :  { %s2159_s17 = smov 0   ;;  %s2161_s18 = smov 0  }
   0x4   :  { %s2163_s19 = smov 0   ;;  %s2165_s20 = smov 0  }
   0x5 LB: > { %s1774_s21 = sadd.s32 4294967295, %s2121_s20   ;;  %s1775_s22 = sadd.s32 4294967294, %s2121_s20   ;;  %s2121_s20 = sphi %s2165_s20, %s18_s20   ;;  %s2117_s19 = sphi %s2163_s19, %s2490_s19   ;;  %s2113_s18 = sphi %s2161_s18, %s2489_s18   ;;  %s2109_s17 = sphi %s2159_s17, %s2488_s17   ;;  %s2105_s16 = sphi %s2157_s16, %s2487_s16   ;;  %s2101_s15 = sphi %s2155_s15, %s2486_s15  }
   0x6   : > { %s30_s23 = sadd.s32 1, %s2117_s19  ;;  %s133_s24 = sadd.s32 1, %s2109_s17 }
   0x7   : > { %p32_p0 = scmp.ge.s32.totalorder %s30_s23, 2  ;;  %p143_p1 = scmp.ne.s32.totalorder %s2109_s17, %s2105_s16 }
   0x8   : > { %p144_p2 = scmp.eq.s32.totalorder %s1774_s21, 1  ;;  %p149_p3 = scmp.ne.s32.totalorder %s2105_s16, %s2101_s15 }
   0x9   : > { %s2492_s23 = smov (%p32_p0, %s30_s23), 0  ;;  %p150_p5 = scmp.eq.s32.totalorder %s1775_s22, 1 }
   0xa   : > { %p2195_p4 = por %p144_p2, %p143_p1  ;;  %s128_s26 = ssub.s32 %s2117_s19, %s2492_s23 }
   0xb   : > { %p1776_p6 = scmp.ge.s32.totalorder %s2121_s20, 1  ;;  %p131_p7 = scmp.eq.s32.totalorder %s128_s26, 0 }
   0xc   : > { %s2477_s25 = scalar_select %p2195_p4, 1, 0 }
   0xd   : > { %p2202_p8 = por %p150_p5, %p149_p3  ;;  %p157_p9 = scmp.lt.s32.totalorder %s2121_s20, 3 }
   0xe   : > { %s2208_s28 = scalar_select %p131_p7, %s2109_s17, %s133_s24  }
   0xf   : > { %s2478_s27 = scalar_select %p2202_p8, 1, 0 }
  0x10   : > { %p2210_p10 = pnand %p1776_p6, %p157_p9  ;;  %p2214_p11 = scmp.eq.s32.totalorder %s1774_s21, 0 }
  0x11   : > { %s2123_s5 = smov [#allocation3]   ;;  %s2011_s10 = scalar_lea.hbm %s2469_s1, 6144 }
  0x12   : > { %s2479_s29 = scalar_select %p2210_p10, 1, 0 }
  0x13   : > { %s2480_s30 = scalar_select %p2214_p11, 1, 0 }
  0x14   : > { %p1946_p12 = pneg %p2210_p10  ;;  %s169_s6 = sshll.u32 %s2123_s5, 4  ;;  %s170_s6 = int_to_ptr.vmem [resolvable:$true] %s169_s6 }
  0x15   : > { %p2012_p0 = scmp.ne.s32.totalorder %s2469_s1, %s2011_s10  ;;  %p2018_p5 = scmp.lt.u32.totalorder %s2011_s10, %s2469_s1 }
  0x16   : > { %p2222_p13 = pnand %p2214_p11, %p1946_p12 }
  0x18   : > { %p2013_p1 = pneg %p2222_p13 }
  0x1a   : > { %p2014_p2 = pnand %p2013_p1, %p2012_p0 }
  0x1c   : > { %p2015_p3 = pneg %p2014_p2 }
  0x1e   : > { %p2020_p6 = pnand %p2018_p5, %p2015_p3 }
  0x20   : > { %2023 = shalt.err (!%p2020_p6)
}
  0x21   : > { %s2024_s21 = scalar_lea.vmem %s170_s6, 6144  ;;  %p2032_p8 = scmp.lt.s32.totalorder %s170_s6, %s170_s6 }
  0x22   : > { %p2025_p7 = scmp.ne.s32.totalorder %s170_s6, %s2024_s21  ;;  %p2033_p4 = scmp.lt.s32.totalorder %s2024_s21, %s2024_s21 }
  0x24   : > { %p2027_p9 = pnand %p2025_p7, %p2013_p1  ;;  %p2034_p11 = por %p2033_p4, %p2032_p8 }
  0x26   : > { %p2028_p12 = pneg %p2027_p9 }
  0x28   : > { %p2035_p10 = pnand %p2034_p11, %p2028_p12 }
  0x2a   : > { %2038 = shalt.err (!%p2035_p10)
}
  0x2b   : > { %s2124_s22 = smov 256   ;;  %s2125_s24 = smov 16  }
  0x2c   : > { %1949 = dma.hbm_to_vmem [thread:$0]  (!%p2222_p13), %s2469_s1, 6144, %s170_s6, [#allocation4], %s2124_s22, %s2124_s22, %s2125_s24  }
  0x2d   : > { %p2482_p0 = scmp.ne.s32.totalorder %s2479_s29, 0 }
  0x2e   : > { %p2483_p2 = scmp.ne.s32.totalorder (!%p2482_p0), %s2480_s30, 0 }
  0x2f   : > { %205 = sbr.rel (%p2482_p0) target bundleno = 593 (0x251), region = 36 }
  0x36   : > { %2092 = dma.done.wait (%p2483_p2), [#allocation4], 6144  }
  0x37   : > { %2094 = vsyncadd (%p2483_p2), [#allocation4], 4294961152  ;;  %p236_p4 = scmp.lt.s32.totalorder %s2113_s18, 1  ;;  %v2126_v0 = vmov 0.0   ;;  %v265_v1 = vld [vmem:[#allocation3 + $0x68] sm:$0xff]  ;;  %v267_v2 = vld [vmem:[#allocation3 + $0x78] sm:$0xff] }
  0x38   : > { %339 = vmatprep.mubr.f32.mxu0 %v2126_v0  ;;  %770 = vmatprep.mubr.f32.mxu1 %v2126_v0  ;;  %v264_v3 = vld [vmem:[#allocation3 + $0x60] sm:$0xff]  ;;  %v1828_v4 = vpack.c.bf16 %v267_v2, %v265_v1  ;;  %v266_v5 = vld [vmem:[#allocation3 + $0x70] sm:$0xff]  ;;  %v622_v6 = vld [vmem:[#allocation3 + $0x28] sm:$0xff]  ;;  %vm268_vm0 = vcmask 130048   ;;  %s233_s24 = sand.u32 1, %s2105_s16   ;;  %s1827_s6 = sshll.u32 %s2113_s18, 10 }
  0x39   : > { %s237_s7 = scalar_select %p236_p4, %s2113_s18, 1  ;;  %v1830_v7 = vpack.c.bf16 %v266_v5, %v264_v3  ;;  %v624_v8 = vld [vmem:[#allocation3 + $0x38] sm:$0xff]  ;;  %v621_v9 = vld [vmem:[#allocation3 + $0x20] sm:$0xff]  ;;  %v623_v10 = vld [vmem:[#allocation3 + $0x30] sm:$0xff] }
  0x3a   : > { %1829 = vmatprep.subr.bf16.mxu0 %v1828_v4  ;;  %v1848_v11 = vpack.c.bf16 %v624_v8, %v622_v6  ;;  %v1850_v12 = vpack.c.bf16 %v623_v10, %v621_v9  ;;  %v261_v13 = vld [vmem:[#allocation3 + $0x8] sm:$0xff]  ;;  %v263_v14 = vld [vmem:[#allocation3 + $0x18] sm:$0xff]  ;;  %v260_v17 = vld [vmem:[#allocation3] sm:$0xff]  ;;  %s2418_s10 = scalar_lea.hbm %s2472_s4, %s1827_s6  ;;  %s2422_s11 = scalar_lea.sflag [#allocation5], %s233_s24 }
  0x3b   : > { %s1826_s8 = sshll.u32 %s237_s7, 6  ;;  %1831 = vmatpush1.bf16.msra.mxu0 %v1830_v7  ;;  %v1832_v16 = vpack.c.bf16 %v263_v14, %v261_v13  ;;  %v262_v18 = vld [vmem:[#allocation3 + $0x10] sm:$0xff]  ;;  %v784_v21 = vld [vmem:[#allocation3 + $0xe8] sm:$0xff]  ;;  %v786_v22 = vld [vmem:[#allocation3 + $0xf8] sm:$0xff]  ;;  %s1782_s7 = sshll.u32 %s233_s24, 6 }
  0x3c   : > { %s2255_s30 = scalar_lea.vmem %s2468_s0, %s1826_s8  ;;  %1849 = vmatprep.subr.bf16.mxu1 %v1848_v11  ;;  %v1834_v19 = vpack.c.bf16 %v262_v18, %v260_v17  ;;  %v1852_v23 = vpack.c.bf16 %v786_v22, %v784_v21  ;;  %v783_v24 = vld [vmem:[#allocation3 + $0xe0] sm:$0xff]  ;;  %v785_v25 = vld [vmem:[#allocation3 + $0xf0] sm:$0xff]  ;;  %v436_v26 = vld [vmem:[#allocation3 + $0xc8] sm:$0xff]  ;;  %s235_s8 = scalar_lea.vmem [#allocation6], %s1782_s7 }
  0x3d   : > { %v2258_v15 = vld [vmem:[%s2255_s30 + $0x10] sm:$0xff]  ;;  %v2261_v20 = vld [vmem:[%s2255_s30] sm:$0xff]  ;;  %1851 = vmatpush1.bf16.msra.mxu1 %v1850_v12  ;;  %1833 = vmatprep.subr.bf16.mxu0 %v1832_v16  ;;  %v1854_v27 = vpack.c.bf16 %v785_v25, %v783_v24  ;;  %v438_v28 = vld [vmem:[#allocation3 + $0xd8] sm:$0xff]  ;;  %s1674_s29 = sshll.u32 %s235_s8, 4  ;;  %p2484_p10 = scmp.ne.s32.totalorder %s2477_s25, 0  ;;  %s2413_s29 = int_to_ptr.vmem [resolvable:$true] %s1674_s29 }
  0x3e   : > { %1785 = vmatmul.mubr.msk.f32.vlgmr.msra.gmra.mrb[0].mxu0 %vm268_vm0, %v2258_v15  ;;  %v2267_v29 = vld [vmem:[%s2255_s30 + $0x18] sm:$0xff]  ;;  %v1836_v30 = vpack.c.bf16 %v438_v28, %v436_v26  ;;  %v869_v31 = vld [vmem:[#allocation3 + $0x148] sm:$0xff]  ;;  %1853 = vmatprep.subr.bf16.mxu1 %v1852_v23  ;;  %v435_v32 = vld [vmem:[#allocation3 + $0xc0] sm:$0xff]  ;;  %s2039_s18 = scalar_lea.vmem %s2413_s29, 1024  ;;  %s2127_s12 = smov [#allocation6]  }
  0x3f   : > { %345 = vmatprep.mubr.f32.mxu0 %v2126_v0  ;;  %1835 = vmatpush1.bf16.msra.mxu0 %v1834_v19  ;;  %v437_v33 = vld [vmem:[#allocation3 + $0xd0] sm:$0xff]  ;;  %v871_v34 = vld [vmem:[#allocation3 + $0x158] sm:$0xff]  ;;  %v2273_v35 = vld [vmem:[%s2255_s30 + $0x8] sm:$0xff]  ;;  %p2040_p8 = scmp.ne.s32.totalorder %s2413_s29, %s2039_s18  ;;  %s2043_s13 = sshll.u32 %s2127_s12, 4  ;;  %s2044_s13 = int_to_ptr.vmem [resolvable:$false] %s2043_s13 }
  0x40   : > { %1795 = vmatmul.mubr.msk.f32.vlgmr.msra.gmra.mrb[0].mxu1 %vm268_vm0, %v2261_v20  ;;  %v1856_v36 = vpack.c.bf16 %v871_v34, %v869_v31  ;;  %v527_v37 = vld [vmem:[#allocation3 + $0x128] sm:$0xff]  ;;  %v529_v38 = vld [vmem:[#allocation3 + $0x138] sm:$0xff]  ;;  %1837 = vmatprep.subr.bf16.mxu0 %v1836_v30  ;;  %v868_v39 = vld [vmem:[#allocation3 + $0x140] sm:$0xff]  ;;  %v1838_v41 = vpack.c.bf16 %v437_v33, %v435_v32  ;;  %s2045_s14 = scalar_lea.vmem %s2044_s13, 2048  ;;  %p2046_p1 = scmp.lt.s32.totalorder %s2413_s29, %s2044_s13 }
  0x41   : > { %776 = vmatprep.mubr.f32.mxu1 %v2126_v0  ;;  %1855 = vmatpush1.bf16.msra.mxu1 %v1854_v27  ;;  %v870_v40 = vld [vmem:[#allocation3 + $0x150] sm:$0xff]  ;;  %v1840_v42 = vpack.c.bf16 %v529_v38, %v527_v37  ;;  %v2282_v43 = vld [vmem:[%s2255_s30 + $0x20] sm:$0xff]  ;;  %v2291_v47 = vld [vmem:[%s2255_s30 + $0x28] sm:$0xff]  ;;  %p2041_p11 = pnand %p2040_p8, %p2484_p10  ;;  %p2047_p3 = scmp.lt.s32.totalorder %s2045_s14, %s2039_s18 }
  0x42   : > { %1786 = vmatmul.mubr.msk.f32.gmra.mrb[2].mxu0 %vm268_vm0, %v2267_v29  ;;  %1857 = vmatprep.subr.bf16.mxu1 %v1856_v36  ;;  %v1858_v44 = vpack.c.bf16 %v870_v40, %v868_v39  ;;  %v526_v45 = vld [vmem:[#allocation3 + $0x120] sm:$0xff]  ;;  %v528_v46 = vld [vmem:[#allocation3 + $0x130] sm:$0xff]  ;;  %v626_v48 = vld [vmem:[#allocation3 + $0x88] sm:$0xff] }
  0x43   : > { %422 = vmatprep.mubr.f32.mxu0 %v2126_v0  ;;  %v628_v49 = vld [vmem:[#allocation3 + $0x98] sm:$0xff]  ;;  %v1842_v50 = vpack.c.bf16 %v528_v46, %v526_v45  ;;  %v2300_v52 = vld [vmem:[%s2255_s30 + $0x30] sm:$0xff]  ;;  %v625_v53 = vld [vmem:[#allocation3 + $0x80] sm:$0xff]  ;;  %p2042_p13 = pneg %p2041_p11  ;;  %p2048_p5 = por %p2047_p3, %p2046_p1 }
  0x44   : > { %1796 = vmatmul.mubr.msk.f32.gmra.mrb[2].mxu1 %vm268_vm0, %v2273_v35  ;;  %v1844_v51 = vpack.c.bf16 %v628_v49, %v626_v48  ;;  %v627_v54 = vld [vmem:[#allocation3 + $0x90] sm:$0xff]  ;;  %v259_v55 = vld [vmem:[%s2255_s30 + $0x38] sm:$0xff]  ;;  %v962_v56 = vld [vmem:[#allocation3 + $0xa8] sm:$0xff] }
  0x45   : > { %851 = vmatprep.mubr.f32.mxu1 %v2126_v0  ;;  %v964_v57 = vld [vmem:[#allocation3 + $0xb8] sm:$0xff]  ;;  %v1846_v58 = vpack.c.bf16 %v627_v54, %v625_v53  ;;  %v961_v60 = vld [vmem:[#allocation3 + $0xa0] sm:$0xff]  ;;  %v963_v61 = vld [vmem:[#allocation3 + $0xb0] sm:$0xff]  ;;  %p2049_p6 = pnand %p2048_p5, %p2042_p13 }
  0x46   : > { %1787 = vmatmul.mubr.msk.f32.vlgmr.msra.gmra.mrb[0].mxu0 %vm268_vm0, %v2261_v20  ;;  %v1860_v59 = vpack.c.bf16 %v964_v57, %v962_v56  ;;  %v958_v62 = vld [vmem:[#allocation3 + $0x48] sm:$0xff]  ;;  %v960_v63 = vld [vmem:[#allocation3 + $0x58] sm:$0xff]  ;;  %v1862_v1 = vpack.c.bf16 %v963_v61, %v961_v60  ;;  %v957_v3 = vld [vmem:[#allocation3 + $0x40] sm:$0xff]  ;;  %v1631_v56 = vlaneseq }
  0x47   : > { %428 = vmatprep.mubr.f32.mxu0 %v2126_v0  ;;  %1839 = vmatpush1.bf16.msra.mxu0 %v1838_v41  ;;  %v1864_v2 = vpack.c.bf16 %v960_v63, %v958_v62  ;;  %v959_v4 = vld [vmem:[#allocation3 + $0x50] sm:$0xff]  ;;  %v1120_v5 = vld [vmem:[#allocation3 + $0x108] sm:$0xff]  ;;  %v1122_v6 = vld [vmem:[#allocation3 + $0x118] sm:$0xff] }
  0x48   : > { %1797 = vmatmul.mubr.msk.f32.vlgmr.msra.gmra.mrb[0].mxu1 %vm268_vm0, %v2282_v43  ;;  %1841 = vmatprep.subr.bf16.mxu0 %v1840_v42  ;;  %v1866_v7 = vpack.c.bf16 %v959_v4, %v957_v3  ;;  %v1868_v8 = vpack.c.bf16 %v1122_v6, %v1120_v5  ;;  %v1119_v9 = vld [vmem:[#allocation3 + $0x100] sm:$0xff]  ;;  %v1121_v10 = vld [vmem:[#allocation3 + $0x110] sm:$0xff]  ;;  %v1205_v11 = vld [vmem:[#allocation3 + $0x168] sm:$0xff]  ;;  %v1632_v57 = vshrl.u32 %v1631_v56, 7 }
  0x49   : > { %857 = vmatprep.mubr.f32.mxu1 %v2126_v0  ;;  %1859 = vmatpush1.bf16.msra.mxu1 %v1858_v44  ;;  %v1207_v12 = vld [vmem:[#allocation3 + $0x178] sm:$0xff]  ;;  %v1870_v13 = vpack.c.bf16 %v1121_v10, %v1119_v9  ;;  %v1206_v16 = vld [vmem:[#allocation3 + $0x170] sm:$0xff]  ;;  %v1301_v38 = vld [vmem:[%s2470_s2 + $0x20] sm:$0xff] }
  0x4a   : > { %1788 = vmatmul.mubr.msk.f32.gmra.mrb[2].mxu0 %vm268_vm0, %v2273_v35  ;;  %v1872_v14 = vpack.c.bf16 %v1207_v12, %v1205_v11  ;;  %v1302_v39 = vld [vmem:[%s2470_s2 + $0x28] sm:$0xff]  ;;  %v1303_v40 = vld [vmem:[%s2470_s2 + $0x30] sm:$0xff]  ;;  %v1304_v41 = vld [vmem:[%s2470_s2 + $0x38] sm:$0xff]  ;;  %v1637_v60 = vsub.s32 1, %v1632_v57 }
  0x4b   : > { %509 = vmatprep.mubr.f32.mxu0 %v2126_v0  ;;  %v1293_v42 = vld [vmem:[%s2470_s2] sm:$0xff]  ;;  %v1295_v46 = vld [vmem:[%s2470_s2 + $0x10] sm:$0xff]  ;;  %v1513_v53 = vld [vmem:[%s2470_s2 + $0x48] sm:$0xff] }
  0x4c   : > { %1798 = vmatmul.mubr.msk.f32.gmra.mrb[2].mxu1 %vm268_vm0, %v2291_v47  ;;  %v1514_v54 = vld [vmem:[%s2470_s2 + $0x50] sm:$0xff] }
  0x4d   : > { %936 = vmatprep.mubr.f32.mxu1 %v2126_v0 }
  0x4e   : > { %1789 = vmatmul.mubr.msk.f32.vlgmr.msra.gmra.mrb[0].mxu0 %vm268_vm0, %v2282_v43 }
  0x4f   : > { %515 = vmatprep.mubr.f32.mxu0 %v2126_v0  ;;  %1843 = vmatpush1.bf16.msra.mxu0 %v1842_v50 }
  0x50   : > { %1799 = vmatmul.mubr.msk.f32.vlgmr.msra.gmra.mrb[0].mxu1 %vm268_vm0, %v2300_v52  ;;  %1845 = vmatprep.subr.bf16.mxu0 %v1844_v51  ;;  %v1296_v51 = vld [vmem:[%s2470_s2 + $0x18] sm:$0xff] }
  0x51   : > { %942 = vmatprep.mubr.f32.mxu1 %v2126_v0 }
  0x52   : > { %1790 = vmatmul.mubr.msk.f32.gmra.mrb[2].mxu0 %vm268_vm0, %v2291_v47 }
  0x53   : > { %600 = vmatprep.mubr.f32.mxu0 %v2126_v0 }
  0x54   : > { %1800 = vmatmul.mubr.msk.f32.gmra.mrb[2].mxu1 %vm268_vm0, %v259_v55 }
  0x55   : > { %1386 = vmatprep.mubr.f32.mxu1 %v2126_v0 }
  0x56   : > { %1791 = vmatmul.mubr.msk.f32.vlgmr.msra.gmra.mrb[0].mxu0 %vm268_vm0, %v2300_v52 }
  0x57   : > { %606 = vmatprep.mubr.f32.mxu0 %v2126_v0  ;;  %1847 = vmatpush1.bf16.msra.mxu0 %v1846_v58  ;;  %v1633_v58 = vsub.s32 0, %v1632_v57 }
  0x58   : > { %1861 = vmatprep.subr.bf16.mxu0 %v1860_v59  ;;  %v1629_v59 = vld [vmem:[%s2471_s3] sm:$0x3] }
  0x59   : > { %v1634_v61 = vrot.slane %v1629_v59, %v1633_v58  ;;  %v1638_v62 = vrot.slane %v1629_v59, %v1637_v60 }
  0x5a   : > { %1792 = vmatmul.mubr.msk.f32.gmra.mrb[2].mxu0 %vm268_vm0, %v259_v55 }
  0x5b   : > { %693 = vmatprep.mubr.f32.mxu0 %v2126_v0 }
  0x5e   : > { %1793 = vmatmul.mubr.msk.f32.vlgmr.msra.gmra.mrb[4].mxu0 %vm268_vm0, %v2258_v15 }
  0x5f   : > { %699 = vmatprep.mubr.f32.mxu0 %v2126_v0  ;;  %1863 = vmatpush1.bf16.msra.mxu0 %v1862_v1 }
  0x60   : > { %1865 = vmatprep.subr.bf16.mxu0 %v1864_v2 }
  0x62   : > { %1794 = vmatmul.mubr.msk.f32.gmra.mrb[6].mxu0 %vm268_vm0, %v2267_v29 }
  0x63   : > { %1029 = vmatprep.mubr.f32.mxu0 %v2126_v0 }
  0x66   : > { %1801 = vmatmul.mubr.msk.f32.vlgmr.msra.gmra.mrb[8].mxu0 %vm268_vm0, %v2258_v15  ;;  %v1204_v15 = vld [vmem:[#allocation3 + $0x160] sm:$0xff] }
  0x67   : > { %1035 = vmatprep.mubr.f32.mxu0 %v2126_v0  ;;  %1867 = vmatpush1.bf16.msra.mxu0 %v1866_v7  ;;  %v1874_v17 = vpack.c.bf16 %v1206_v16, %v1204_v15 }
  0x68   : > { %1869 = vmatprep.subr.bf16.mxu0 %v1868_v8 }
  0x6a   : > { %1802 = vmatmul.mubr.msk.f32.gmra.mrb[10].mxu0 %vm268_vm0, %v2267_v29 }
  0x6b   : > { %1106 = vmatprep.mubr.f32.mxu0 %v2126_v0 }
  0x6e   : > { %1803 = vmatmul.mubr.msk.f32.vlgmr.msra.gmra.mrb[8].mxu0 %vm268_vm0, %v2261_v20 }
  0x6f   : > { %1112 = vmatprep.mubr.f32.mxu0 %v2126_v0  ;;  %1871 = vmatpush1.bf16.msra.mxu0 %v1870_v13 }
  0x70   : > { %1873 = vmatprep.subr.bf16.mxu0 %v1872_v14 }
  0x72   : > { %1804 = vmatmul.mubr.msk.f32.gmra.mrb[10].mxu0 %vm268_vm0, %v2273_v35 }
  0x73   : > { %1187 = vmatprep.mubr.f32.mxu0 %v2126_v0 }
  0x76   : > { %1805 = vmatmul.mubr.msk.f32.vlgmr.msra.gmra.mrb[8].mxu0 %vm268_vm0, %v2282_v43  ;;  %v1294_v43 = vld [vmem:[%s2470_s2 + $0x8] sm:$0xff] }
  0x77   : > { %1193 = vmatprep.mubr.f32.mxu0 %v2126_v0  ;;  %1875 = vmatpush1.bf16.msra.mxu0 %v1874_v17 }
  0x7a   : > { %1806 = vmatmul.mubr.msk.f32.gmra.mrb[10].mxu0 %vm268_vm0, %v2291_v47 }
  0x7b   : > { %1272 = vmatprep.mubr.f32.mxu0 %v2126_v0 }
  0x7e   : > { %1807 = vmatmul.mubr.msk.f32.vlgmr.msra.gmra.mrb[8].mxu0 %vm268_vm0, %v2300_v52  ;;  %v1512_v52 = vld [vmem:[%s2470_s2 + $0x40] sm:$0xff] }
  0x7f   : > { %1278 = vmatprep.mubr.f32.mxu0 %v2126_v0 }
  0x82   : > { %1808 = vmatmul.mubr.msk.f32.gmra.mrb[10].mxu0 %vm268_vm0, %v259_v55  ;;  %v1515_v55 = vld [vmem:[%s2470_s2 + $0x58] sm:$0xff] }
 0x123   : > { %v938_v18 = vpop.f32.mrb[0].mxu1 }
 0x124   : > { %v940_v19 = vpop.f32.mrb[1].mxu1 }
 0x127   : > { %v944_v20 = vpop.f32.mrb[2].mxu1 }
 0x128   : > { %v946_v21 = vpop.f32.mrb[3].mxu1 }
 0x129   : > { %v602_v22 = vpop.f32.mrb[0].mxu0 }
 0x12a   : > { %v604_v23 = vpop.f32.mrb[1].mxu0 }
 0x12d   : > { %v608_v24 = vpop.f32.mrb[2].mxu0 }
 0x12e   : > { %v1882_v25 = vpack.c.bf16 %v608_v24, %v602_v22  ;;  %v610_v26 = vpop.f32.mrb[3].mxu0 }
 0x12f   : > { %v1880_v27 = vpack.c.bf16 %v610_v26, %v604_v23 }
 0x131   : > { %v695_v28 = vpop.f32.mrb[4].mxu0 }
 0x132   : > { %v1888_v29 = vadd.f32 %v938_v18, %v695_v28  ;;  %v697_v30 = vpop.f32.mrb[5].mxu0 }
 0x133   : > { %v1889_v31 = vadd.f32 %v940_v19, %v697_v30 }
 0x135   : > { %v701_v32 = vpop.f32.mrb[6].mxu0 }
 0x136   : > { %v1890_v33 = vadd.f32 %v944_v20, %v701_v32  ;;  %v703_v34 = vpop.f32.mrb[7].mxu0 }
 0x137   : > { %v1891_v35 = vadd.f32 %v946_v21, %v703_v34 }
 0x138   : > { %v1878_v36 = vpack.c.bf16 %v1890_v33, %v1888_v29 }
 0x139   : > { %v1876_v37 = vpack.c.bf16 %v1891_v35, %v1889_v31 }
 0x13b   : > { %1877 = vmatprep.subr.bf16.mxu1 %v1876_v37 }
 0x13c   : > { %1879 = vmatpush1.bf16.msra.mxu1 %v1878_v36 }
 0x13d   : > { %1881 = vmatprep.subr.bf16.mxu1 %v1880_v27 }
 0x13f   : > { %1809 = vmatmul.mubr.msk.f32.vlgmr.msra.gmra.mrb[4].mxu1 %vm268_vm0, %v1301_v38 }
 0x140   : > { %1883 = vmatpush1.bf16.msra.mxu1 %v1882_v25  ;;  %1392 = vmatprep.mubr.f32.mxu1 %v2126_v0 }
 0x143   : > { %1810 = vmatmul.mubr.msk.f32.gmra.mrb[6].mxu1 %vm268_vm0, %v1302_v39 }
 0x144   : > { %1398 = vmatprep.mubr.f32.mxu1 %v2126_v0 }
 0x147   : > { %1811 = vmatmul.mubr.msk.f32.gmra.mrb[8].mxu1 %vm268_vm0, %v1303_v40 }
 0x148   : > { %1404 = vmatprep.mubr.f32.mxu1 %v2126_v0 }
 0x14b   : > { %1812 = vmatmul.mubr.msk.f32.gmra.mrb[10].mxu1 %vm268_vm0, %v1304_v41 }
 0x14c   : > { %1487 = vmatprep.mubr.f32.mxu1 %v2126_v0 }
 0x14f   : > { %1813 = vmatmul.mubr.msk.f32.vlgmr.msra.gmra.mrb[4].mxu1 %vm268_vm0, %v1293_v42 }
 0x150   : > { %1493 = vmatprep.mubr.f32.mxu1 %v2126_v0 }
 0x151   : > { %v1274_v44 = vpop.f32.mrb[8].mxu0 }
 0x152   : > { %v1276_v45 = vpop.f32.mrb[9].mxu0 }
 0x153   : > { %1814 = vmatmul.mubr.msk.f32.gmra.mrb[6].mxu1 %vm268_vm0, %v1294_v43 }
 0x154   : > { %1499 = vmatprep.mubr.f32.mxu1 %v2126_v0 }
 0x155   : > { %v1280_v47 = vpop.f32.mrb[10].mxu0 }
 0x156   : > { %v1886_v48 = vpack.c.bf16 %v1280_v47, %v1274_v44  ;;  %v1282_v49 = vpop.f32.mrb[11].mxu0 }
 0x157   : > { %v1884_v50 = vpack.c.bf16 %v1282_v49, %v1276_v45  ;;  %1815 = vmatmul.mubr.msk.f32.gmra.mrb[8].mxu1 %vm268_vm0, %v1295_v46 }
 0x158   : > { %1505 = vmatprep.mubr.f32.mxu1 %v2126_v0 }
 0x159   : > { %1885 = vmatprep.subr.bf16.mxu1 %v1884_v50 }
 0x15a   : > { %1887 = vmatpush1.bf16.msra.mxu1 %v1886_v48 }
 0x15b   : > { %1816 = vmatmul.mubr.msk.f32.gmra.mrb[10].mxu1 %vm268_vm0, %v1296_v51 }
 0x15c   : > { %1596 = vmatprep.mubr.f32.mxu1 %v2126_v0 }
 0x15f   : > { %1817 = vmatmul.mubr.msk.f32.vlgmr.msra.gmra.mrb[4].mxu1 %vm268_vm0, %v1512_v52 }
 0x160   : > { %1602 = vmatprep.mubr.f32.mxu1 %v2126_v0 }
 0x163   : > { %1818 = vmatmul.mubr.msk.f32.gmra.mrb[6].mxu1 %vm268_vm0, %v1513_v53 }
 0x164   : > { %1608 = vmatprep.mubr.f32.mxu1 %v2126_v0 }
 0x167   : > { %1819 = vmatmul.mubr.msk.f32.gmra.mrb[8].mxu1 %vm268_vm0, %v1514_v54 }
 0x168   : > { %1614 = vmatprep.mubr.f32.mxu1 %v2126_v0 }
 0x16b   : > { %1820 = vmatmul.mubr.msk.f32.gmra.mrb[10].mxu1 %vm268_vm0, %v1515_v55 }
 0x232   : > { %v1598_v0 = vpop.f32.mrb[4].mxu1 }
 0x233   : > { %v1641_v63 = vadd.f32 %v1634_v61, %v1598_v0  ;;  %v1600_v1 = vpop.f32.mrb[5].mxu1 }
 0x234   : > { %v1642_v2 = vadd.f32 %v1638_v62, %v1600_v1 }
 0x235   : > { %1649 = vst [vmem:[%s235_s8] sm:$0xff] %v1641_v63 }
 0x236   : > { %1650 = vst [vmem:[%s235_s8 + $0x8] sm:$0xff] %v1642_v2  ;;  %v1604_v3 = vpop.f32.mrb[6].mxu1 }
 0x237   : > { %v1643_v4 = vadd.f32 %v1634_v61, %v1604_v3  ;;  %v1606_v5 = vpop.f32.mrb[7].mxu1 }
 0x238   : > { %v1644_v6 = vadd.f32 %v1638_v62, %v1606_v5 }
 0x239   : > { %1651 = vst [vmem:[%s235_s8 + $0x10] sm:$0xff] %v1643_v4 }
 0x23a   : > { %1652 = vst [vmem:[%s235_s8 + $0x18] sm:$0xff] %v1644_v6  ;;  %v1610_v7 = vpop.f32.mrb[8].mxu1 }
 0x23b   : > { %v1645_v8 = vadd.f32 %v1634_v61, %v1610_v7  ;;  %v1612_v9 = vpop.f32.mrb[9].mxu1 }
 0x23c   : > { %v1646_v10 = vadd.f32 %v1638_v62, %v1612_v9 }
 0x23d   : > { %1653 = vst [vmem:[%s235_s8 + $0x20] sm:$0xff] %v1645_v8 }
 0x23e   : > { %1654 = vst [vmem:[%s235_s8 + $0x28] sm:$0xff] %v1646_v10  ;;  %v1616_v11 = vpop.f32.mrb[10].mxu1 }
 0x23f   : > { %v1647_v12 = vadd.f32 %v1634_v61, %v1616_v11  ;;  %v1618_v13 = vpop.f32.mrb[11].mxu1 }
 0x240   : > { %v1648_v14 = vadd.f32 %v1638_v62, %v1618_v13 }
 0x241   : > { %1655 = vst [vmem:[%s235_s8 + $0x30] sm:$0xff] %v1647_v12 }
 0x242   : > { %1656 = vst [vmem:[%s235_s8 + $0x38] sm:$0xff] %v1648_v14 }
 0x243   : > { %2052 = shalt.err (!%p2049_p6)
}
 0x244   : > { %s2053_s21 = scalar_lea.hbm %s2418_s10, 1024  ;;  %s2057_s26 = scalar_lea.hbm %s2472_s4, 2048 }
 0x245   : > { %p2054_p7 = scmp.ne.s32.totalorder %s2418_s10, %s2053_s21  ;;  %p2058_p0 = scmp.lt.u32.totalorder %s2418_s10, %s2472_s4 }
 0x246   : > { %p2059_p2 = scmp.lt.u32.totalorder %s2057_s26, %s2053_s21  ;;  %p2061_p8 = scmp.lt.u32.totalorder %s2053_s21, %s2418_s10 }
 0x247   : > { %p2055_p9 = pnand %p2054_p7, %p2484_p10 }
 0x248   : > { %p2060_p4 = por %p2059_p2, %p2058_p0 }
 0x249   : > { %p2056_p12 = pneg %p2055_p9 }
 0x24a   : > { %p2062_p11 = por %p2061_p8, %p2060_p4 }
 0x24c   : > { %p2063_p13 = pnand %p2062_p11, %p2056_p12 }
 0x24e   : > { %2066 = shalt.err (!%p2063_p13)
}
 0x24f   : > { %s2128_s8 = smov 256   ;;  %s2129_s6 = smov 16  }
 0x250   : > { %1944 = dma.vmem_to_hbm [thread:$0]  (%p2484_p10), %s2413_s29, 1024, %s2418_s10, %s2422_s11, %s2128_s8, %s2128_s8, %s2129_s6  }
 0x251 PF: > { %p1956_p1 = scmp.ge.s32.totalorder %s2121_s20, 2  ;;  %s1689_s30 = sand.u32 1, %s2101_s15  }
 0x252   : > { %p2485_p3 = scmp.ne.s32.totalorder %s2478_s27, 0  ;;  %s1690_s9 = scalar_lea.sflag [#allocation5], %s1689_s30 }
 0x254   : > { %p1951_p5 = pnand %p1956_p1, %p2485_p3 }
 0x256   : > { %2096 = dma.done.wait (!%p1951_p5), %s1690_s9, 1024  }
 0x257   : > { %2098 = vsyncadd (!%p1951_p5), %s1690_s9, 4294966272  ;;  %s18_s20 = sadd.s32 1, %s2121_s20   ;;  %s2486_s15 = smov %s2105_s16 }
 0x258   : > { %p15_p6 = scmp.ge.s32.totalorder %s18_s20, 4   ;;  %s2487_s16 = smov %s2109_s17 }
 0x259   : > { %s2488_s17 = smov %s2208_s28  ;;  %s2489_s18 = smov %s2117_s19 }
 0x25a   : > { %s2490_s19 = smov %s2492_s23  ;;  %17 = sbr.rel (!%p15_p6) target bundleno = 5 (0x5), region = 83 }
 0x261   :  { %1695 = vsyncpa [#allocation4], 1 }
 0x262   :  { %1697 = vsyncpa [#allocation4 + $0x1], 1 }
 0x263   :  { %1698 = vsyncpa [#allocation5], 1 }
 0x264   :  { %1700 = vsyncpa [#allocation5 + $0x1], 1 }

</bundles_post_ra>
